<compile_context>
chip_gen: v7x
topology: tpu7x:2x2x1
jax: 0.10.0
libtpu: 0.0.40
codegen_flags: <defaults>
</compile_context>

<pallas_src>
import functools

import jax
import jax.numpy as jnp
from jax import lax
from jax.experimental import pallas as pl
from jax.experimental.pallas import tpu as pltpu


def _pick_tile_rows(rows: int, hidden: int, itemsize: int,
                    max_tile: int = 1024) -> int:
    """Largest row-tile that fits a conservative VMEM budget and divides rows."""
    budget = 24 << 20                      # bytes for x, y, out, double-buffered
    per_row = hidden * itemsize * 3 * 2    # 3 streams x 2 buffers
    cap = max(1, min(max_tile, budget // per_row, rows))
    if rows <= cap:
        return rows                        # full extent -> always layout-legal
    pack = max(8, 32 // itemsize)          # 8 for f32, 16 for bf16, 32 for int8
    fallback = 1
    for t in range(cap, 0, -1):
        if rows % t == 0:
            if t % pack == 0:
                return t
            if fallback == 1:
                fallback = t
    return fallback


def _make_addnorm_kernel(dropout_p: float, use_bias: bool, training: bool,
                         eps: float, tile_rows: int, hidden: int):
    apply_dropout = (not use_bias) and training and dropout_p > 0.0
    inv_keep = 1.0 / (1.0 - dropout_p) if apply_dropout else 1.0
    # 24-bit dropout threshold (keeps the compare in safe signed-int range).
    thresh24 = int(round(dropout_p * (1 << 24))) if apply_dropout else 0

    def _body(x_ref, y_ref, gamma_ref, beta_ref, bias_ref, o_ref, seed_ref):
        x = x_ref[...].astype(jnp.float32)
        y = y_ref[...].astype(jnp.float32)

        if use_bias:
            z = x + y + bias_ref[...].astype(jnp.float32)
        else:
            if apply_dropout:
                # Counter-based hash PRNG (splitmix32-style) on the global
                # element index. Pure vector integer ops -> portable (TPU +
                # interpret mode) and invariant to tiling / grid order, so the
                # row axis can safely be "parallel".
                shape = (tile_rows, hidden)
                row = lax.broadcasted_iota(jnp.int32, shape, 0)
                col = lax.broadcasted_iota(jnp.int32, shape, 1)
                grow = pl.program_id(0) * tile_rows + row
                idx = (grow * hidden + col).astype(jnp.uint32)
                k = idx ^ seed_ref[0].astype(jnp.uint32)
                k = k + jnp.uint32(0x9E3779B9)
                k = k ^ (k >> jnp.uint32(16))
                k = k * jnp.uint32(0x85EBCA6B)
                k = k ^ (k >> jnp.uint32(13))
                k = k * jnp.uint32(0xC2B2AE35)
                k = k ^ (k >> jnp.uint32(16))
                bits24 = (k >> jnp.uint32(8)).astype(jnp.int32)   # in [0, 2^24)
                keep = (bits24 >= jnp.int32(thresh24)).astype(jnp.float32)
                y = y * keep * jnp.float32(inv_keep)
            z = x + y

        # LayerNorm over the last axis (biased variance, like torch.nn.LayerNorm).
        mean = jnp.mean(z, axis=-1, keepdims=True)
        zc = z - mean
        var = jnp.mean(zc * zc, axis=-1, keepdims=True)
        inv = lax.rsqrt(var + jnp.float32(eps))
        gamma = gamma_ref[...].astype(jnp.float32)
        beta = beta_ref[...].astype(jnp.float32)
        o_ref[...] = (zc * inv * gamma + beta).astype(o_ref.dtype)

    if use_bias:
        def kernel(x_ref, y_ref, gamma_ref, beta_ref, bias_ref, o_ref):
            _body(x_ref, y_ref, gamma_ref, beta_ref, bias_ref, o_ref, None)
    elif apply_dropout:
        def kernel(seed_ref, x_ref, y_ref, gamma_ref, beta_ref, o_ref):
            _body(x_ref, y_ref, gamma_ref, beta_ref, None, o_ref, seed_ref)
    else:
        def kernel(x_ref, y_ref, gamma_ref, beta_ref, o_ref):
            _body(x_ref, y_ref, gamma_ref, beta_ref, None, o_ref, None)

    return kernel


@functools.partial(jax.jit,
                   static_argnames=("dropout_p", "use_bias", "training",
                                    "eps", "tile_rows"))
def addnorm(x, y, gamma, beta, bias=None, seed=0, *, dropout_p=0.0,
            use_bias=False, training=True, eps=1e-5, tile_rows=None):
    orig_shape = x.shape
    hidden = orig_shape[-1]
    rows = 1
    for d in orig_shape[:-1]:
        rows *= d

    if tile_rows is None:
        tile_rows = _pick_tile_rows(rows, hidden, x.dtype.itemsize)
    assert rows % tile_rows == 0, "tile_rows must divide batch*seq"
    grid = (rows // tile_rows,)

    apply_dropout = (not use_bias) and training and dropout_p > 0.0

    x2 = x.reshape(rows, hidden)
    y2 = y.reshape(rows, hidden)
    gamma2 = gamma.reshape(1, hidden)
    beta2 = beta.reshape(1, hidden)

    kernel = _make_addnorm_kernel(dropout_p, use_bias, training, eps,
                                  tile_rows, hidden)

    # index_maps take (grid_i, *scalar_prefetch_refs) -> swallow trailing refs.
    row_spec = pl.BlockSpec((tile_rows, hidden), lambda i, *_: (i, 0))
    vec_spec = pl.BlockSpec((1, hidden), lambda i, *_: (0, 0))

    in_specs = [row_spec, row_spec, vec_spec, vec_spec]
    call_args = [x2, y2, gamma2, beta2]
    num_scalar_prefetch = 0
    if use_bias:
        assert bias is not None
        in_specs = in_specs + [vec_spec]
        call_args = call_args + [bias.reshape(1, hidden)]
    elif apply_dropout:
        num_scalar_prefetch = 1
        seed_arr = jnp.asarray(seed, dtype=jnp.int32).reshape(1)
        call_args = [seed_arr] + call_args

    out2 = pl.pallas_call(
        kernel,
        out_shape=jax.ShapeDtypeStruct((rows, hidden), x.dtype),
        grid_spec=pltpu.PrefetchScalarGridSpec(
            num_scalar_prefetch=num_scalar_prefetch,
            grid=grid,
            in_specs=in_specs,
            out_specs=row_spec,
        ),
        compiler_params=pltpu.CompilerParams(
            # Rows are independent (mask keyed on global index) -> megacore-safe.
            dimension_semantics=("parallel",),
            vmem_limit_bytes=48 * 1024 * 1024,
        ),
    )(*call_args)

    return out2.reshape(orig_shape)


if __name__ == "__main__":
    batch, seq, hidden = 2, 8, 32
    normalized_shape = hidden

    key = jax.random.PRNGKey(0)
    kx, ky = jax.random.split(key)
    X = jax.random.normal(kx, (batch, seq, hidden), dtype=jnp.float32)
    Y = jax.random.normal(ky, (batch, seq, hidden), dtype=jnp.float32)

    # nn.LayerNorm defaults and nn.Parameter(torch.zeros(normalized_shape)).
    gamma = jnp.ones((normalized_shape,), dtype=jnp.float32)
    beta = jnp.zeros((normalized_shape,), dtype=jnp.float32)
    bias = jnp.zeros((normalized_shape,), dtype=jnp.float32)

    def ref(x, y, extra, g, b, eps=1e-5):
        z = x + y + extra
        m = z.mean(-1, keepdims=True)
        v = ((z - m) ** 2).mean(-1, keepdims=True)
        return (z - m) * lax.rsqrt(v + eps) * g + b

    # Path 1: use_bias=False, training=True, p=0.1 -> LayerNorm(X + Dropout(Y)).
    # TODO(synk): dropout mask comes from an in-kernel hash PRNG, not torch's RNG
    # stream (same Bernoulli(1-p) inverted-dropout semantics, different draws).
    out_drop = addnorm(X, Y, gamma, beta, None, seed=0,
                       dropout_p=0.1, use_bias=False, training=True)
    jax.block_until_ready(out_drop)
    assert out_drop.shape == (batch, seq, hidden)
    assert bool(jnp.all(jnp.isfinite(out_drop)))

    # Path 2: use_bias=False, eval mode -> exact LayerNorm(X + Y).
    out_eval = addnorm(X, Y, gamma, beta, None, seed=0,
                       dropout_p=0.1, use_bias=False, training=False)
    jax.block_until_ready(out_eval)
    assert bool(jnp.allclose(out_eval, ref(X, Y, 0.0, gamma, beta),
                             atol=2e-5, rtol=2e-5))

    # Path 3: use_bias=True -> LayerNorm(X + Y + bias).
    out_bias = addnorm(X, Y, gamma, beta, bias, seed=0,
                       dropout_p=0.1, use_bias=True, training=True)
    jax.block_until_ready(out_bias)
    assert bool(jnp.allclose(out_bias, ref(X, Y, bias, gamma, beta),
                             atol=2e-5, rtol=2e-5))

    print("KERNEL_OK")
</pallas_src>

<mosaic_0001>
module attributes {stable_mosaic.version = 11 : i64} {
  func.func @kernel(%arg0: i32, %arg1: memref<1xi32, #tpu.memory_space<smem>>, %arg2: memref<16x32xf32, #tpu.memory_space<vmem>>, %arg3: memref<16x32xf32, #tpu.memory_space<vmem>>, %arg4: memref<1x32xf32, #tpu.memory_space<vmem>>, %arg5: memref<1x32xf32, #tpu.memory_space<vmem>>, %arg6: memref<16x32xf32, #tpu.memory_space<vmem>>) attributes {dimension_semantics = [#tpu.dimension_semantics<parallel>], iteration_bounds = array<i64: 1>, scalar_prefetch = 1 : i64, scratch_operands = 0 : i64, tpu.core_type = #tpu.core_type<tc>, window_params = [{transform_indices = @transform_0, window_bounds = array<i64: 16, 32>}, {transform_indices = @transform_1, window_bounds = array<i64: 16, 32>}, {pipeline_mode = #tpu.pipeline_mode<synchronous>, transform_indices = @transform_2, window_bounds = array<i64: 1, 32>}, {pipeline_mode = #tpu.pipeline_mode<synchronous>, transform_indices = @transform_3, window_bounds = array<i64: 1, 32>}, {transform_indices = @transform_4, window_bounds = array<i64: 16, 32>}]} {
    %c0 = arith.constant 0 : index
    %c0_0 = arith.constant 0 : index
    %0 = vector.load %arg2[%c0, %c0_0] : memref<16x32xf32, #tpu.memory_space<vmem>>, vector<16x32xf32>
    %c0_1 = arith.constant 0 : index
    %c0_2 = arith.constant 0 : index
    %1 = vector.load %arg3[%c0_1, %c0_2] : memref<16x32xf32, #tpu.memory_space<vmem>>, vector<16x32xf32>
    %2 = tpu.iota {dimensions = array<i32: 0>} : vector<16x32xi32>
    %3 = tpu.iota {dimensions = array<i32: 1>} : vector<16x32xi32>
    %c16_i32 = arith.constant 16 : i32
    %4 = arith.muli %arg0, %c16_i32 : i32
    %5 = vector.broadcast %4 : i32 to vector<16x32xi32>
    %6 = arith.addi %5, %2 : vector<16x32xi32>
    %c32_i32 = arith.constant 32 : i32
    %7 = vector.broadcast %c32_i32 : i32 to vector<16x32xi32>
    %8 = arith.muli %6, %7 : vector<16x32xi32>
    %9 = arith.addi %8, %3 : vector<16x32xi32>
    %c0_3 = arith.constant 0 : index
    %10 = memref.load %arg1[%c0_3] : memref<1xi32, #tpu.memory_space<smem>>
    %11 = vector.broadcast %10 : i32 to vector<16x32xi32>
    %12 = arith.xori %9, %11 : vector<16x32xi32>
    %c-1640531527_i32 = arith.constant -1640531527 : i32
    %13 = vector.broadcast %c-1640531527_i32 : i32 to vector<16x32xi32>
    %14 = arith.addi %12, %13 : vector<16x32xi32>
    %c16_i32_4 = arith.constant 16 : i32
    %15 = vector.broadcast %c16_i32_4 : i32 to vector<16x32xi32>
    %16 = arith.shrui %14, %15 : vector<16x32xi32>
    %17 = arith.xori %14, %16 : vector<16x32xi32>
    %c-2048144789_i32 = arith.constant -2048144789 : i32
    %18 = vector.broadcast %c-2048144789_i32 : i32 to vector<16x32xi32>
    %19 = arith.muli %17, %18 : vector<16x32xi32>
    %c13_i32 = arith.constant 13 : i32
    %20 = vector.broadcast %c13_i32 : i32 to vector<16x32xi32>
    %21 = arith.shrui %19, %20 : vector<16x32xi32>
    %22 = arith.xori %19, %21 : vector<16x32xi32>
    %c-1028477387_i32 = arith.constant -1028477387 : i32
    %23 = vector.broadcast %c-1028477387_i32 : i32 to vector<16x32xi32>
    %24 = arith.muli %22, %23 : vector<16x32xi32>
    %c16_i32_5 = arith.constant 16 : i32
    %25 = vector.broadcast %c16_i32_5 : i32 to vector<16x32xi32>
    %26 = arith.shrui %24, %25 : vector<16x32xi32>
    %27 = arith.xori %24, %26 : vector<16x32xi32>
    %c8_i32 = arith.constant 8 : i32
    %28 = vector.broadcast %c8_i32 : i32 to vector<16x32xi32>
    %29 = arith.shrui %27, %28 : vector<16x32xi32>
    %c1677722_i32 = arith.constant 1677722 : i32
    %30 = vector.broadcast %c1677722_i32 : i32 to vector<16x32xi32>
    %31 = arith.cmpi sge, %29, %30 : vector<16x32xi32>
    %32 = arith.extui %31 : vector<16x32xi1> to vector<16x32xi32>
    %33 = arith.sitofp %32 : vector<16x32xi32> to vector<16x32xf32>
    %34 = arith.mulf %1, %33 : vector<16x32xf32>
    %cst = arith.constant 1.11111116 : f32
    %35 = vector.broadcast %cst : f32 to vector<16x32xf32>
    %36 = arith.mulf %34, %35 : vector<16x32xf32>
    %37 = arith.addf %0, %36 : vector<16x32xf32>
    %cst_6 = arith.constant dense<0.000000e+00> : vector<16xf32>
    %38 = vector.multi_reduction <add>, %37, %cst_6 [1] : vector<16x32xf32> to vector<16xf32>
    %39 = vector.shape_cast %38 : vector<16xf32> to vector<16x1xf32>
    %cst_7 = arith.constant 3.200000e+01 : f32
    %40 = vector.broadcast %cst_7 : f32 to vector<16x1xf32>
    %41 = arith.divf %39, %40 : vector<16x1xf32>
    %42 = vector.broadcast %41 : vector<16x1xf32> to vector<16x32xf32>
    %43 = arith.subf %37, %42 : vector<16x32xf32>
    %44 = arith.mulf %43, %43 : vector<16x32xf32>
    %cst_8 = arith.constant dense<0.000000e+00> : vector<16xf32>
    %45 = vector.multi_reduction <add>, %44, %cst_8 [1] : vector<16x32xf32> to vector<16xf32>
    %46 = vector.shape_cast %45 : vector<16xf32> to vector<16x1xf32>
    %cst_9 = arith.constant 3.200000e+01 : f32
    %47 = vector.broadcast %cst_9 : f32 to vector<16x1xf32>
    %48 = arith.divf %46, %47 : vector<16x1xf32>
    %cst_10 = arith.constant 9.99999974E-6 : f32
    %49 = vector.broadcast %cst_10 : f32 to vector<16x1xf32>
    %50 = arith.addf %48, %49 : vector<16x1xf32>
    %51 = math.rsqrt %50 : vector<16x1xf32>
    %c0_11 = arith.constant 0 : index
    %c0_12 = arith.constant 0 : index
    %52 = vector.load %arg4[%c0_11, %c0_12] : memref<1x32xf32, #tpu.memory_space<vmem>>, vector<1x32xf32>
    %c0_13 = arith.constant 0 : index
    %c0_14 = arith.constant 0 : index
    %53 = vector.load %arg5[%c0_13, %c0_14] : memref<1x32xf32, #tpu.memory_space<vmem>>, vector<1x32xf32>
    %54 = vector.broadcast %51 : vector<16x1xf32> to vector<16x32xf32>
    %55 = arith.mulf %43, %54 : vector<16x32xf32>
    %56 = vector.broadcast %52 : vector<1x32xf32> to vector<16x32xf32>
    %57 = arith.mulf %55, %56 : vector<16x32xf32>
    %58 = vector.broadcast %53 : vector<1x32xf32> to vector<16x32xf32>
    %59 = arith.addf %57, %58 : vector<16x32xf32>
    %c0_15 = arith.constant 0 : index
    %c0_16 = arith.constant 0 : index
    %60 = vector.load %arg6[%c0_15, %c0_16] : memref<16x32xf32, #tpu.memory_space<vmem>>, vector<16x32xf32>
    tpu.vector_store %arg6[%c0_15, %c0_16], %59 {strides = array<i32>} : memref<16x32xf32, #tpu.memory_space<vmem>>, vector<16x32xf32>,
    return
  }
  func.func @transform_0(%arg0: i32, %arg1: memref<1xi32, #tpu.memory_space<smem>>) -> (i32, i32) {
    %c0_i32 = arith.constant 0 : i32
    %c0_i32_0 = arith.constant 0 : i32
    return %arg0, %c0_i32 : i32, i32
  }
  func.func @transform_1(%arg0: i32, %arg1: memref<1xi32, #tpu.memory_space<smem>>) -> (i32, i32) {
    %c0_i32 = arith.constant 0 : i32
    %c0_i32_0 = arith.constant 0 : i32
    return %arg0, %c0_i32 : i32, i32
  }
  func.func @transform_2(%arg0: i32, %arg1: memref<1xi32, #tpu.memory_space<smem>>) -> (i32, i32) {
    %c0_i32 = arith.constant 0 : i32
    %c0_i32_0 = arith.constant 0 : i32
    %c0_i32_1 = arith.constant 0 : i32
    return %c0_i32, %c0_i32_0 : i32, i32
  }
  func.func @transform_3(%arg0: i32, %arg1: memref<1xi32, #tpu.memory_space<smem>>) -> (i32, i32) {
    %c0_i32 = arith.constant 0 : i32
    %c0_i32_0 = arith.constant 0 : i32
    %c0_i32_1 = arith.constant 0 : i32
    return %c0_i32, %c0_i32_0 : i32, i32
  }
  func.func @transform_4(%arg0: i32, %arg1: memref<1xi32, #tpu.memory_space<smem>>) -> (i32, i32) {
    %c0_i32 = arith.constant 0 : i32
    %c0_i32_0 = arith.constant 0 : i32
    return %arg0, %c0_i32 : i32, i32
  }
}

</mosaic_0001>

<bundles_post_ra>
// kernel: addnorm.1
= control target key start
LH: loop header
LB: loop body
LE: loop exit
PB: predicated region body
PF: predicated region fallthrough
CT: control target
= control target key end

     0   :  { %11 = vsyncpa [#allocation5], 0  ;;  %s299_s0 = inlined_call_operand.<no memory space> [shape: s32[1], index: 0, kind: input, shape index: {}]   ;;  %s300_s1 = inlined_call_operand.vmem [shape: f32[16,32], index: 1, kind: input, shape index: {}]   ;;  %s301_s2 = inlined_call_operand.hbm [shape: f32[16,32], index: 2, kind: input, shape index: {}]   ;;  %s302_s3 = inlined_call_operand.vmem [shape: f32[1,32], index: 3, kind: input, shape index: {}]   ;;  %s303_s4 = inlined_call_operand.vmem [shape: f32[1,32], index: 4, kind: input, shape index: {}]   ;;  %s304_s5 = inlined_call_operand.hbm [shape: f32[16,32], index: 5, kind: output, shape index: {}]  }
   0x1   :  { %12 = vsyncpa [#allocation6], 0  ;;  %s213_s18 = smov [#allocation4]   ;;  %s165_s22 = scalar_lea.hbm %s301_s2, 256 }
   0x2   :  { %s20_s19 = sshll.u32 %s213_s18, 4  ;;  %p166_p0 = scmp.ne.s32.totalorder %s301_s2, %s165_s22  ;;  %s21_s19 = int_to_ptr.vmem [resolvable:$true] %s20_s19 }
   0x3   :  { %p169_p1 = scmp.lt.u32.totalorder %s165_s22, %s301_s2 }
   0x5   :  { %p171_p2 = pnand %p169_p1, %p166_p0 }
   0x7   :  { %174 = shalt.err (!%p171_p2)
}
   0x8   :  { %s175_s27 = scalar_lea.vmem %s21_s19, 256  ;;  %p180_p4 = scmp.lt.s32.totalorder %s21_s19, %s21_s19 }
   0x9   :  { %p176_p3 = scmp.ne.s32.totalorder %s21_s19, %s175_s27  ;;  %p181_p5 = scmp.lt.s32.totalorder %s175_s27, %s175_s27 }
   0xb   :  { %p182_p6 = por %p181_p5, %p180_p4 }
   0xd   :  { %p183_p7 = pnand %p182_p6, %p176_p3 }
   0xf   :  { %186 = shalt.err (!%p183_p7)
}
  0x10   :  { %s214_s28 = smov 128   ;;  %s215_s29 = smov 8  }
  0x11   :  { %26 = dma.hbm_to_vmem [thread:$0]  %s301_s2, 256, %s21_s19, [#allocation5], %s214_s28, %s214_s28, %s215_s29  }
  0x12   :  { %209 = dma.done.wait [#allocation5], 256  }
  0x13   :  { %210 = vsyncadd [#allocation5], 4294967040  ;;  %v38_v0 = vlaneseq  ;;  %v52_v5 = vstv %s299_s0  ;;  %v36_v30 = vld [vmem:[#allocation4] sm:$0xff]  ;;  %v216_v32 = vmov 0.0   ;;  %v37_v34 = vld [vmem:[#allocation4 + $0x8] sm:$0xff]  ;;  %vm87_vm2 = vcmask 261120  }
  0x14   :  { %v34_v36 = vld [vmem:[%s300_s1] sm:$0xff]  ;;  %v35_v40 = vld [vmem:[%s300_s1 + $0x8] sm:$0xff]  ;;  %s217_s14 = smov [#allocation7]  }
  0x15   :  { %v39_v1 = vshrl.u32 %v38_v0, 7  ;;  %v42_v2 = vand.u32 127, %v38_v0  ;;  %v154_v63 = vld [vmem:[%s302_s3] ss:$0 sm:$0xff]  ;;  %s140_s15 = sshll.u32 %s217_s14, 4  ;;  %s141_s15 = int_to_ptr.vmem [resolvable:$true] %s140_s15 }
  0x16   :  { %s187_s16 = scalar_lea.vmem %s141_s15, 256  ;;  %p192_p9 = scmp.lt.s32.totalorder %s141_s15, %s141_s15 }
  0x17   :  { %v47_v3 = vmul.u32 32, %v39_v1  ;;  %v40_v4 = vadd.s32 8, %v39_v1  ;;  %v155_v1 = vld [vmem:[%s303_s4] ss:$0 sm:$0xff]  ;;  %p188_p8 = scmp.ne.s32.totalorder %s141_s15, %s187_s16  ;;  %p193_p10 = scmp.lt.s32.totalorder %s187_s16, %s187_s16 }
  0x19   :  { %v49_v6 = vadd.s32 %v47_v3, %v42_v2  ;;  %v48_v7 = vmul.u32 32, %v40_v4  ;;  %p194_p11 = por %p193_p10, %p192_p9 }
  0x1b   :  { %v53_v8 = vxor.u32 %v52_v5, %v49_v6  ;;  %v50_v9 = vadd.s32 %v48_v7, %v42_v2  ;;  %p195_p12 = pnand %p194_p11, %p188_p8 }
  0x1d   :  { %v55_v10 = vadd.s32 2654435769, %v53_v8  ;;  %v54_v11 = vxor.u32 %v52_v5, %v50_v9 }
  0x1f   :  { %v57_v12 = vshrl.u32 %v55_v10, 16  ;;  %v56_v13 = vadd.s32 2654435769, %v54_v11 }
  0x21   :  { %v59_v14 = vxor.u32 %v57_v12, %v55_v10  ;;  %v58_v15 = vshrl.u32 %v56_v13, 16 }
  0x23   :  { %v61_v16 = vmul.u32 2246822507, %v59_v14  ;;  %v60_v17 = vxor.u32 %v58_v15, %v56_v13 }
  0x25   :  { %v63_v18 = vshrl.u32 %v61_v16, 13  ;;  %v62_v19 = vmul.u32 2246822507, %v60_v17 }
  0x27   :  { %v65_v20 = vxor.u32 %v63_v18, %v61_v16  ;;  %v64_v21 = vshrl.u32 %v62_v19, 13 }
  0x29   :  { %v67_v22 = vmul.u32 3266489909, %v65_v20  ;;  %v66_v23 = vxor.u32 %v64_v21, %v62_v19 }
  0x2b   :  { %v69_v24 = vshrl.u32 %v67_v22, 16  ;;  %v68_v25 = vmul.u32 3266489909, %v66_v23 }
  0x2d   :  { %v71_v26 = vxor.u32 %v69_v24, %v67_v22  ;;  %v70_v27 = vshrl.u32 %v68_v25, 16 }
  0x2f   :  { %v73_v28 = vshrl.u32 %v71_v26, 8  ;;  %v72_v29 = vxor.u32 %v70_v27, %v68_v25 }
  0x31   :  { %vm75_vm0 = vcmp.ge.s32.totalorder %v73_v28, 1677722  ;;  %v74_v31 = vshrl.u32 %v72_v29, 8 }
  0x32   :  { %v152_v33 = vsel %vm75_vm0, 1.0, %v216_v32 }
  0x33   :  { %v81_v35 = vmul.f32 %v152_v33, %v36_v30  ;;  %vm76_vm1 = vcmp.ge.s32.totalorder %v74_v31, 1677722 }
  0x34   :  { %v153_v37 = vsel %vm76_vm1, 1.0, %v216_v32 }
  0x35   :  { %v83_v38 = vmul.f32 1.1111112, %v81_v35  ;;  %v82_v39 = vmul.f32 %v153_v37, %v37_v34 }
  0x37   :  { %v85_v41 = vadd.f32 %v83_v38, %v34_v36  ;;  %v84_v42 = vmul.f32 1.1111112, %v82_v39 }
  0x39   :  { %v88_v43 = vsel %vm87_vm2, %v85_v41, 0.0  ;;  %v86_v44 = vadd.f32 %v84_v42, %v35_v40 }
  0x3a   :  { %89 = vadd.xlane.f32.xlu0 %v88_v43 }
  0x3b   :  { %v91_v45 = vsel %vm87_vm2, %v86_v44, 0.0 }
  0x3e   :  { %92 = vadd.xlane.f32.xlu0 %v91_v45 }
  0xc7   :  { %v90_v46 = vpop.xlane.xlu0 %89 }
  0xc8   :  { %v95_v47 = vmul.f32 0.03125, %v90_v46 }
  0xca   :  { %v97_v48 = vsub.f32 %v85_v41, %v95_v47 }
  0xcb   :  { %v93_v49 = vpop.xlane.xlu0 %92 }
  0xcc   :  { %v96_v50 = vmul.f32 0.03125, %v93_v49  ;;  %v99_v51 = vmul.f32 %v97_v48, %v97_v48 }
  0xce   :  { %v98_v52 = vsub.f32 %v86_v44, %v96_v50  ;;  %v101_v53 = vsel %vm87_vm2, %v99_v51, 0.0 }
  0xcf   :  { %102 = vadd.xlane.f32.xlu1 %v101_v53 }
  0xd0   :  { %v100_v54 = vmul.f32 %v98_v52, %v98_v52 }
  0xd2   :  { %v104_v55 = vsel %vm87_vm2, %v100_v54, 0.0 }
  0xd3   :  { %105 = vadd.xlane.f32.xlu1 %v104_v55 }
 0x15c   :  { %v103_v56 = vpop.xlane.xlu1 %102 }
 0x15d   :  { %v107_v57 = vmul.f32 0.03125, %v103_v56 }
 0x15f   :  { %v109_v58 = vadd.f32 1e-05, %v107_v57 }
 0x160   :  { %v106_v59 = vpop.xlane.xlu1 %105 }
 0x161   :  { %161 = vrsqrt.f32 %v109_v58  ;;  %v108_v60 = vmul.f32 0.03125, %v106_v59 }
 0x163   :  { %v110_v61 = vadd.f32 1e-05, %v108_v60 }
 0x165   :  { %163 = vrsqrt.f32 %v110_v61 }
 0x16b   :  { %v162_v62 = vpop.eup %161 }
 0x16c   :  { %v115_v0 = vmul.f32 %v162_v62, %v97_v48 }
 0x16e   :  { %v123_v2 = vmul.f32 %v154_v63, %v115_v0 }
 0x16f   :  { %v164_v3 = vpop.eup %163 }
 0x170   :  { %v116_v4 = vmul.f32 %v164_v3, %v98_v52  ;;  %v131_v5 = vadd.f32 %v155_v1, %v123_v2 }
 0x172   :  { %v124_v6 = vmul.f32 %v154_v63, %v116_v4  ;;  %133 = vst.msk [vmem:[#allocation7] sm:$0xff] %vm87_vm2, %v131_v5 }
 0x174   :  { %v132_v7 = vadd.f32 %v155_v1, %v124_v6 }
 0x176   :  { %134 = vst.msk [vmem:[#allocation7 + $0x8] sm:$0xff] %vm87_vm2, %v132_v7 }
 0x177   :  { %198 = shalt.err (!%p195_p12)
}
 0x178   :  { %s199_s17 = scalar_lea.hbm %s304_s5, 256 }
 0x179   :  { %p200_p13 = scmp.ne.s32.totalorder %s304_s5, %s199_s17  ;;  %p203_p0 = scmp.lt.u32.totalorder %s199_s17, %s304_s5 }
 0x17b   :  { %p205_p1 = pnand %p203_p0, %p200_p13 }
 0x17d   :  { %208 = shalt.err (!%p205_p1)
}
 0x17e   :  { %146 = dma.vmem_to_hbm [thread:$0]  %s141_s15, 256, %s304_s5, [#allocation6], %s214_s28, %s214_s28, %s215_s29  }
 0x17f   :  { %211 = dma.done.wait [#allocation6], 256  }
 0x180   :  { %212 = vsyncadd [#allocation6], 4294967040 }
 0x181   :  { %150 = vsyncpa [#allocation5], 1 }
 0x182   :  { %151 = vsyncpa [#allocation6], 1 }

</bundles_post_ra>
